<compile_context>
chip_gen: v5e
topology: v5e:2x2
jax: 0.10.0
libtpu: 0.0.40
codegen_flags: <defaults>
</compile_context>

<pallas_src>
import functools

import jax
import jax.numpy as jnp
from jax.experimental import pallas as pl
from jax.experimental.pallas import tpu as pltpu

MIN_NORM = 1e-15
EPS_F32 = 4e-3          # PoincareBall.eps[torch.float32]
ATANH_CLAMP = 1e-15     # artanh input clamp used by the HGCN manifold code


def _round_up(x, m):
    return ((x + m - 1) // m) * m


def hyp_act_kernel(x_ref, o_ref, *, c_in, c_out, act):
    sqrt_ci = c_in ** 0.5
    sqrt_co = c_out ** 0.5

    x = x_ref[...].astype(jnp.float32)                       # (TM, D)

    # ---- logmap0(x, c_in): (1/sqrt_c) * artanh(sqrt_c * ||x||) * x / ||x|| ----
    x_sq = jnp.sum(x * x, axis=-1, keepdims=True)            # (TM, 1)  XLU reduce
    x_norm = jnp.maximum(jnp.sqrt(x_sq), MIN_NORM)
    t = jnp.clip(sqrt_ci * x_norm, -1.0 + ATANH_CLAMP, 1.0 - ATANH_CLAMP)
    artanh_t = 0.5 * (jnp.log1p(t) - jnp.log1p(-t))           # EUP
    log_scale = artanh_t / (sqrt_ci * x_norm)                 # per-row scalar
    xt = log_scale * x                                        # broadcast mul

    # ---- activation ----
    if act == "relu":
        xt = jnp.maximum(xt, 0.0)
    elif act == "identity":
        pass
    else:
        raise NotImplementedError(act)

    # ---- proj_tan0 is identity for the Poincare ball ----

    # ---- expmap0(xt, c_out): tanh(sqrt_c * ||u||) * u / (sqrt_c * ||u||) ----
    u_sq = jnp.sum(xt * xt, axis=-1, keepdims=True)           # (TM, 1)  XLU reduce
    u_norm_raw = jnp.sqrt(u_sq)
    u_norm = jnp.maximum(u_norm_raw, MIN_NORM)
    tanh_u = jnp.tanh(sqrt_co * u_norm)                       # EUP
    exp_scale = tanh_u / (sqrt_co * u_norm)                   # per-row scalar
    gamma = exp_scale * xt

    # ---- proj(gamma, c_out) ----
    # ||gamma|| = exp_scale * ||xt||  (exactly, since exp_scale >= 0); avoids a
    # third full-width cross-lane reduction.
    g_norm = jnp.maximum(exp_scale * u_norm_raw, MIN_NORM)
    maxnorm = (1.0 - EPS_F32) / sqrt_co
    proj_factor = jnp.where(g_norm > maxnorm, maxnorm / g_norm, 1.0)
    out = gamma * proj_factor

    o_ref[...] = out.astype(o_ref.dtype)


def hyp_act(x, c_in, c_out, act="relu", tm=None):
    """x: [N, D] float array of points on the c_in Poincare ball."""
    n, d = x.shape

    # Lane-dense feature axis: pad D up to a multiple of 128 (zeros are inert
    # for the row-wise sums-of-squares).
    d_pad = max(128, _round_up(d, 128))

    # Row tile: 256 by default (fills the MXU-era sublane budget and amortizes
    # per-grid-step overhead); shrink if the f32 in+out double-buffered tiles
    # would blow the VMEM budget, never below 8.
    if tm is None:
        tm = min(256, _round_up(n, 8))
        # 2 arrays (in + out) x 2 pipeline buffers x tm x d_pad x 4 B
        while tm > 8 and (2 * 2 * tm * d_pad * 4) > (24 << 20):
            tm = max(8, _round_up(tm // 2, 8))
    tm = max(8, _round_up(tm, 8))

    n_pad = _round_up(n, tm)

    xp = x
    if (n_pad != n) or (d_pad != d):
        xp = jnp.pad(x, ((0, n_pad - n), (0, d_pad - d)))

    kernel = functools.partial(
        hyp_act_kernel, c_in=float(c_in), c_out=float(c_out), act=act)

    out = pl.pallas_call(
        kernel,
        out_shape=jax.ShapeDtypeStruct((n_pad, d_pad), x.dtype),
        grid_spec=pltpu.PrefetchScalarGridSpec(
            num_scalar_prefetch=0,
            grid=(pl.cdiv(n_pad, tm),),
            in_specs=[pl.BlockSpec((tm, d_pad), lambda i: (i, 0))],
            out_specs=pl.BlockSpec((tm, d_pad), lambda i: (i, 0)),
        ),
        compiler_params=pltpu.CompilerParams(
            dimension_semantics=("parallel",),
            vmem_limit_bytes=64 * 1024 * 1024,
        ),
    )(xp)

    if (n_pad != n) or (d_pad != d):
        out = out[:n, :d]
    return out


def hyp_act_ref(x, c_in, c_out, act="relu"):
    """Pure-JAX reference mirroring the torch PoincareBall ops (for verification)."""
    sqrt_ci = c_in ** 0.5
    sqrt_co = c_out ** 0.5

    # logmap0
    x_norm = jnp.maximum(jnp.linalg.norm(x, axis=-1, keepdims=True), MIN_NORM)
    t = jnp.clip(sqrt_ci * x_norm, -1.0 + ATANH_CLAMP, 1.0 - ATANH_CLAMP)
    artanh_t = 0.5 * (jnp.log1p(t) - jnp.log1p(-t))
    xt = artanh_t / (sqrt_ci * x_norm) * x

    # activation
    if act == "relu":
        xt = jnp.maximum(xt, 0.0)
    elif act == "identity":
        pass
    else:
        raise NotImplementedError(act)

    # proj_tan0 is identity; expmap0 with c_out
    u_norm = jnp.maximum(jnp.linalg.norm(xt, axis=-1, keepdims=True), MIN_NORM)
    gamma = jnp.tanh(sqrt_co * u_norm) * xt / (sqrt_co * u_norm)

    # proj with c_out
    g_norm = jnp.maximum(jnp.linalg.norm(gamma, axis=-1, keepdims=True), MIN_NORM)
    maxnorm = (1.0 - EPS_F32) / sqrt_co
    return jnp.where(g_norm > maxnorm, gamma / g_norm * maxnorm, gamma)


if __name__ == "__main__":
    key = jax.random.PRNGKey(0)

    N, D = 16, 32
    C_IN, C_OUT = 1.0, 0.7

    # Small vectors comfortably inside the c_in Poincare ball.
    x = 0.1 * jax.random.normal(key, (N, D), dtype=jnp.float32)

    out = hyp_act(x, C_IN, C_OUT, act="relu")
    out = jax.block_until_ready(out)

    ref = hyp_act_ref(x, C_IN, C_OUT, act="relu")
    assert out.shape == (N, D)
    assert jnp.allclose(out, ref, atol=1e-5, rtol=1e-5), "mismatch vs JAX reference"

    print("KERNEL_OK")
</pallas_src>

<mosaic_0001>
module attributes {stable_mosaic.version = 11 : i64} {
  func.func @hyp_act_kernel(%arg0: i32, %arg1: memref<16x128xf32, #tpu.memory_space<vmem>>, %arg2: memref<16x128xf32, #tpu.memory_space<vmem>>) attributes {dimension_semantics = [#tpu.dimension_semantics<parallel>], iteration_bounds = array<i64: 1>, scalar_prefetch = 0 : i64, scratch_operands = 0 : i64, tpu.core_type = #tpu.core_type<tc>, window_params = [{transform_indices = @transform_0, window_bounds = array<i64: 16, 128>}, {transform_indices = @transform_1, window_bounds = array<i64: 16, 128>}]} {
    %c0 = arith.constant 0 : index
    %c0_0 = arith.constant 0 : index
    %0 = vector.load %arg1[%c0, %c0_0] : memref<16x128xf32, #tpu.memory_space<vmem>>, vector<16x128xf32>
    %1 = arith.mulf %0, %0 : vector<16x128xf32>
    %cst = arith.constant dense<0.000000e+00> : vector<16xf32>
    %2 = vector.multi_reduction <add>, %1, %cst [1] : vector<16x128xf32> to vector<16xf32>
    %3 = vector.shape_cast %2 : vector<16xf32> to vector<16x1xf32>
    %4 = math.sqrt %3 : vector<16x1xf32>
    %cst_1 = arith.constant 1.000000e-15 : f32
    %5 = vector.broadcast %cst_1 : f32 to vector<16x1xf32>
    %6 = arith.maximumf %4, %5 : vector<16x1xf32>
    %cst_2 = arith.constant 1.000000e+00 : f32
    %7 = vector.broadcast %cst_2 : f32 to vector<16x1xf32>
    %8 = arith.mulf %7, %6 : vector<16x1xf32>
    %cst_3 = arith.constant -1.000000e+00 : f32
    %cst_4 = arith.constant 1.000000e+00 : f32
    %9 = vector.broadcast %cst_3 : f32 to vector<16x1xf32>
    %10 = arith.maximumf %9, %8 : vector<16x1xf32>
    %11 = vector.broadcast %cst_4 : f32 to vector<16x1xf32>
    %12 = arith.minimumf %11, %10 : vector<16x1xf32>
    %13 = math.log1p %12 : vector<16x1xf32>
    %cst_5 = arith.constant 0.000000e+00 : f32
    %14 = vector.broadcast %cst_5 : f32 to vector<16x1xf32>
    %15 = arith.subf %14, %12 : vector<16x1xf32>
    %16 = math.log1p %15 : vector<16x1xf32>
    %17 = arith.subf %13, %16 : vector<16x1xf32>
    %cst_6 = arith.constant 5.000000e-01 : f32
    %18 = vector.broadcast %cst_6 : f32 to vector<16x1xf32>
    %19 = arith.mulf %18, %17 : vector<16x1xf32>
    %cst_7 = arith.constant 1.000000e+00 : f32
    %20 = vector.broadcast %cst_7 : f32 to vector<16x1xf32>
    %21 = arith.mulf %20, %6 : vector<16x1xf32>
    %22 = arith.divf %19, %21 : vector<16x1xf32>
    %23 = vector.broadcast %22 : vector<16x1xf32> to vector<16x128xf32>
    %24 = arith.mulf %23, %0 : vector<16x128xf32>
    %cst_8 = arith.constant 0.000000e+00 : f32
    %25 = vector.broadcast %cst_8 : f32 to vector<16x128xf32>
    %26 = arith.maximumf %24, %25 : vector<16x128xf32>
    %27 = arith.mulf %26, %26 : vector<16x128xf32>
    %cst_9 = arith.constant dense<0.000000e+00> : vector<16xf32>
    %28 = vector.multi_reduction <add>, %27, %cst_9 [1] : vector<16x128xf32> to vector<16xf32>
    %29 = vector.shape_cast %28 : vector<16xf32> to vector<16x1xf32>
    %30 = math.sqrt %29 : vector<16x1xf32>
    %cst_10 = arith.constant 1.000000e-15 : f32
    %31 = vector.broadcast %cst_10 : f32 to vector<16x1xf32>
    %32 = arith.maximumf %30, %31 : vector<16x1xf32>
    %cst_11 = arith.constant 8.366600e-01 : f32
    %33 = vector.broadcast %cst_11 : f32 to vector<16x1xf32>
    %34 = arith.mulf %33, %32 : vector<16x1xf32>
    %35 = math.tanh %34 : vector<16x1xf32>
    %cst_12 = arith.constant 8.366600e-01 : f32
    %36 = vector.broadcast %cst_12 : f32 to vector<16x1xf32>
    %37 = arith.mulf %36, %32 : vector<16x1xf32>
    %38 = arith.divf %35, %37 : vector<16x1xf32>
    %39 = vector.broadcast %38 : vector<16x1xf32> to vector<16x128xf32>
    %40 = arith.mulf %39, %26 : vector<16x128xf32>
    %41 = arith.mulf %38, %30 : vector<16x1xf32>
    %cst_13 = arith.constant 1.000000e-15 : f32
    %42 = vector.broadcast %cst_13 : f32 to vector<16x1xf32>
    %43 = arith.maximumf %41, %42 : vector<16x1xf32>
    %cst_14 = arith.constant 1.19044769 : f32
    %44 = vector.broadcast %cst_14 : f32 to vector<16x1xf32>
    %45 = arith.cmpf ogt, %43, %44 : vector<16x1xf32>
    %cst_15 = arith.constant 1.19044769 : f32
    %46 = vector.broadcast %cst_15 : f32 to vector<16x1xf32>
    %47 = arith.divf %46, %43 : vector<16x1xf32>
    %cst_16 = arith.constant 1.000000e+00 : f32
    %48 = vector.broadcast %cst_16 : f32 to vector<16x1xf32>
    %49 = arith.select %45, %47, %48 : vector<16x1xi1>, vector<16x1xf32>
    %50 = vector.broadcast %49 : vector<16x1xf32> to vector<16x128xf32>
    %51 = arith.mulf %40, %50 : vector<16x128xf32>
    %c0_17 = arith.constant 0 : index
    %c0_18 = arith.constant 0 : index
    %52 = vector.load %arg2[%c0_17, %c0_18] : memref<16x128xf32, #tpu.memory_space<vmem>>, vector<16x128xf32>
    tpu.vector_store %arg2[%c0_17, %c0_18], %51 {strides = array<i32>} : memref<16x128xf32, #tpu.memory_space<vmem>>, vector<16x128xf32>,
    return
  }
  func.func @transform_0(%arg0: i32) -> (i32, i32) {
    %c0_i32 = arith.constant 0 : i32
    %c0_i32_0 = arith.constant 0 : i32
    return %arg0, %c0_i32 : i32, i32
  }
  func.func @transform_1(%arg0: i32) -> (i32, i32) {
    %c0_i32 = arith.constant 0 : i32
    %c0_i32_0 = arith.constant 0 : i32
    return %arg0, %c0_i32 : i32, i32
  }
}

</mosaic_0001>

<bundles_post_ra>
// kernel: tpu_custom_call.1
= control target key start
LH: loop header
LB: loop body
LE: loop exit
PB: predicated region body
PF: predicated region fallthrough
CT: control target
= control target key end

     0   :  { %6 = vsyncpa [#allocation3], 0  ;;  %s428_s0 = inlined_call_operand.hbm [shape: f32[16,128], index: 0, kind: input, shape index: {}]   ;;  %s429_s1 = inlined_call_operand.hbm [shape: f32[16,128], index: 1, kind: output, shape index: {}]  }
   0x1   :  { %7 = vsyncpa [#allocation4], 0  ;;  %s12_s8 = sshll.u32 %s428_s0, 4  ;;  %s358_s9 = smov [#allocation2]   ;;  %s13_s8 = int_to_ptr.hbm [resolvable:$true] %s12_s8 }
   0x2   :  { %s14_s10 = sshll.u32 %s358_s9, 4  ;;  %s359_s11 = smov 128   ;;  %s15_s10 = int_to_ptr.vmem [resolvable:$true] %s14_s10 }
   0x3   :  { %s360_s12 = smov 8  }
   0x4   :  { %20 = dma.hbm_to_vmem [thread:$0]  %s13_s8, 256, %s15_s10, [#allocation3], %s359_s11, %s359_s11, %s360_s12  }
   0x5   :  { %354 = dma.done.wait [#allocation3], 256  }
   0x6   :  { %355 = vsyncadd [#allocation3], 4294967040  ;;  %v378_v0 = vld [vmem:[#allocation2] sm:$0xff]  ;;  %v382_v2 = vld [vmem:[#allocation2 + $0x8] sm:$0xff]  ;;  %s361_s0 = smov [#allocation5]   ;;  %s255_s16 = sshll.u32 %s429_s1, 4  ;;  %s256_s16 = int_to_ptr.hbm [resolvable:$true] %s255_s16 }
   0x7   :  { %v27_v1 = vmul.f32 %v378_v0, %v378_v0  ;;  %v28_v3 = vmul.f32 %v382_v2, %v382_v2  ;;  %s253_s13 = sshll.u32 %s361_s0, 4  ;;  %s254_s13 = int_to_ptr.vmem [resolvable:$true] %s253_s13 }
   0x9   :  { %29 = vadd.xlane.f32.xlu0 %v27_v1 }
  0x11   :  { %31 = vadd.xlane.f32.xlu0 %v28_v3 }
  0x7c   :  { %v30_v4 = vpop.xlane.xlu0 %29 }
  0x7d   :  { %274 = vrsqrt.f32 %v30_v4  ;;  %vm40_vm0 = vcmp.eq.f32.partialorder %v30_v4, inf  ;;  %v43_v16 = vand.u32 2147483648, %v30_v4  ;;  %vm42_vm1 = vcmp.eq.f32.partialorder %v30_v4, 0.0 }
  0x83   :  { %v275_v5 = vpop.eup %274 }
  0x84   :  { %v34_v6 = vmul.f32 %v275_v5, %v30_v4  ;;  %v32_v7 = vpop.xlane.xlu0 %31 }
  0x85   :  { %276 = vrsqrt.f32 %v32_v7  ;;  %vm52_vm2 = vcmp.eq.f32.partialorder %v32_v7, inf  ;;  %v55_v26 = vand.u32 2147483648, %v32_v7  ;;  %vm54_vm3 = vcmp.eq.f32.partialorder %v32_v7, 0.0 }
  0x86   :  { %v35_v8 = vmul.f32 %v275_v5, %v34_v6 }
  0x88   :  { %v36_v9 = vmul.f32 0.5, %v35_v8 }
  0x8a   :  { %v37_v10 = vsub.f32 1.5, %v36_v9 }
  0x8b   :  { %v277_v11 = vpop.eup %276 }
  0x8c   :  { %v38_v12 = vmul.f32 %v275_v5, %v37_v10  ;;  %v46_v13 = vmul.f32 %v277_v11, %v32_v7 }
  0x8e   :  { %v39_v14 = vmul.f32 %v38_v12, %v30_v4  ;;  %v47_v15 = vmul.f32 %v277_v11, %v46_v13 }
  0x90   :  { %v41_v17 = vsel %vm40_vm0, %v30_v4, %v39_v14  ;;  %v48_v18 = vmul.f32 0.5, %v47_v15 }
  0x91   :  { %v44_v19 = vsel %vm42_vm1, %v43_v16, %v41_v17 }
  0x92   :  { %v386_v20 = vmax.f32 %v44_v19, 1e-15  ;;  %v49_v21 = vsub.f32 1.5, %v48_v18 }
  0x94   :  { %278 = vrcp.f32 %v386_v20  ;;  %v50_v22 = vmul.f32 %v277_v11, %v49_v21  ;;  %v268_v23 = vclamps-f32 %v386_v20, 1.0  ;;  %vm110_vm4 = vweird.f32 %v386_v20 }
  0x95   :  { %v116_v51 = vand.u32 2147483648, %v386_v20  ;;  %v114_v57 = vand.u32 2147483647, %v386_v20 }
  0x96   :  { %v51_v24 = vmul.f32 %v50_v22, %v32_v7  ;;  %v63_v25 = vadd.f32 1.0, %v268_v23  ;;  %v81_v27 = vsub.f32 0.0, %v268_v23  ;;  %v66_v33 = vmul.f32 -0.5, %v268_v23 }
  0x97   :  { %v69_v43 = vand.u32 2147483647, %v268_v23  ;;  %v117_v6 = vor.u32 1.1754944e-38, %v116_v51  ;;  %vm115_vm9 = vcmp.eq.f32.partialorder %v114_v57, 8.507059e+37 }
  0x98   :  { %v53_v28 = vsel %vm52_vm2, %v32_v7, %v51_v24  ;;  %280 = vlog2.f32 %v63_v25  ;;  %v83_v30 = vadd.f32 1.0, %v81_v27  ;;  %v86_v34 = vmul.f32 -0.5, %v81_v27 }
  0x99   :  { %v56_v29 = vsel %vm54_vm3, %v55_v26, %v53_v28  ;;  %v67_v39 = vadd.f32 1.0, %v66_v33  ;;  %v89_v44 = vand.u32 2147483647, %v81_v27  ;;  %vm70_vm6 = vcmp.lt.f32.partialorder %v69_v43, 0.0004427343 }
  0x9a   :  { %v279_v31 = vpop.eup %278  ;;  %v390_v32 = vmax.f32 %v56_v29, 1e-15  ;;  %282 = vlog2.f32 %v83_v30  ;;  %v87_v40 = vadd.f32 1.0, %v86_v34 }
  0x9b   :  { %v106_v35 = vmul.f32 %v279_v31, %v386_v20  ;;  %vm111_vm5 = vweird.f32 %v279_v31  ;;  %v68_v54 = vmul.f32 %v268_v23, %v67_v39  ;;  %vm90_vm7 = vcmp.lt.f32.partialorder %v89_v44, 0.0004427343 }
  0x9c   :  { %284 = vrcp.f32 %v390_v32  ;;  %v269_v36 = vclamps-f32 %v390_v32, 1.0  ;;  %v88_v56 = vmul.f32 %v87_v40, %v81_v27  ;;  %vm401_vm8 = vmor %vm110_vm4, %vm111_vm5  ;;  %v131_v15 = vand.u32 2147483648, %v390_v32 }
  0x9d   :  { %v107_v37 = vsub.f32 1.0, %v106_v35  ;;  %vm125_vm13 = vweird.f32 %v390_v32  ;;  %v129_v20 = vand.u32 2147483647, %v390_v32 }
  0x9e   :  { %v281_v38 = vpop.eup %280  ;;  %v72_v41 = vadd.f32 1.0, %v269_v36  ;;  %v82_v42 = vsub.f32 0.0, %v269_v36  ;;  %v75_v47 = vmul.f32 -0.5, %v269_v36  ;;  %v78_v7 = vand.u32 2147483647, %v269_v36 }
  0x9f   :  { %v108_v45 = vmul.f32 %v279_v31, %v107_v37  ;;  %v65_v46 = vmul.f32 0.6931472, %v281_v38  ;;  %v132_v27 = vor.u32 1.1754944e-38, %v131_v15  ;;  %vm130_vm15 = vcmp.eq.f32.partialorder %v129_v20, 8.507059e+37 }
  0xa0   :  { %286 = vlog2.f32 %v72_v41  ;;  %v92_v48 = vadd.f32 1.0, %v82_v42  ;;  %v283_v49 = vpop.eup %282  ;;  %v95_v52 = vmul.f32 -0.5, %v82_v42  ;;  %v76_v62 = vadd.f32 1.0, %v75_v47 }
  0xa1   :  { %v109_v50 = vadd.f32 %v279_v31, %v108_v45  ;;  %v85_v55 = vmul.f32 0.6931472, %v283_v49  ;;  %v71_v59 = vsel %vm70_vm6, %v68_v54, %v65_v46  ;;  %v98_v8 = vand.u32 2147483647, %v82_v42 }
  0xa2   :  { %v285_v53 = vpop.eup %284  ;;  %288 = vlog2.f32 %v92_v48  ;;  %v96_v3 = vadd.f32 1.0, %v95_v52  ;;  %v77_v14 = vmul.f32 %v269_v36, %v76_v62  ;;  %vm79_vm11 = vcmp.lt.f32.partialorder %v78_v7, 0.0004427343 }
  0xa3   :  { %v121_v58 = vmul.f32 %v285_v53, %v390_v32  ;;  %v91_v60 = vsel %vm90_vm7, %v88_v56, %v85_v55  ;;  %v113_v1 = vsel %vm401_vm8, %v279_v31, %v109_v50  ;;  %vm126_vm10 = vweird.f32 %v285_v53 }
  0xa4   :  { %v101_v63 = vsub.f32 %v71_v59, %v91_v60  ;;  %v118_v13 = vsel %vm115_vm9, %v117_v6, %v113_v1  ;;  %v97_v18 = vmul.f32 %v96_v3, %v82_v42  ;;  %vm99_vm12 = vcmp.lt.f32.partialorder %v98_v8, 0.0004427343  ;;  %vm127_vm14 = vmor %vm125_vm13, %vm126_vm10 }
  0xa5   :  { %v122_v4 = vsub.f32 1.0, %v121_v58 }
  0xa6   :  { %v287_v5 = vpop.eup %286  ;;  %v103_v9 = vmul.f32 0.5, %v101_v63 }
  0xa7   :  { %v74_v10 = vmul.f32 0.6931472, %v287_v5  ;;  %v123_v11 = vmul.f32 %v285_v53, %v122_v4 }
  0xa8   :  { %v289_v12 = vpop.eup %288  ;;  %v119_v16 = vmul.f32 %v118_v13, %v103_v9 }
  0xa9   :  { %v94_v17 = vmul.f32 0.6931472, %v289_v12  ;;  %v124_v19 = vadd.f32 %v285_v53, %v123_v11  ;;  %v80_v22 = vsel %vm79_vm11, %v77_v14, %v74_v10 }
  0xaa   :  { %v135_v21 = vmul.f32 %v119_v16, %v378_v0 }
  0xab   :  { %v100_v23 = vsel %vm99_vm12, %v97_v18, %v94_v17  ;;  %v128_v25 = vsel %vm127_vm14, %v285_v53, %v124_v19 }
  0xac   :  { %v102_v24 = vsub.f32 %v80_v22, %v100_v23  ;;  %v411_v26 = vmax.f32 %v135_v21, 0.0  ;;  %v133_v30 = vsel %vm130_vm15, %v132_v27, %v128_v25 }
  0xae   :  { %v104_v28 = vmul.f32 0.5, %v102_v24  ;;  %v139_v29 = vmul.f32 %v411_v26, %v411_v26 }
  0xb0   :  { %v134_v31 = vmul.f32 %v133_v30, %v104_v28  ;;  %141 = vadd.xlane.f32.xlu1 %v139_v29 }
  0xb2   :  { %v136_v32 = vmul.f32 %v134_v31, %v382_v2 }
  0xb4   :  { %v416_v33 = vmax.f32 %v136_v32, 0.0 }
  0xb6   :  { %v140_v0 = vmul.f32 %v416_v33, %v416_v33 }
  0xb8   :  { %143 = vadd.xlane.f32.xlu1 %v140_v0 }
 0x123   :  { %v142_v34 = vpop.xlane.xlu1 %141 }
 0x124   :  { %290 = vrsqrt.f32 %v142_v34  ;;  %vm152_vm0 = vcmp.eq.f32.partialorder %v142_v34, inf  ;;  %v155_v45 = vand.u32 2147483648, %v142_v34  ;;  %vm154_vm1 = vcmp.eq.f32.partialorder %v142_v34, 0.0 }
 0x12a   :  { %v291_v35 = vpop.eup %290 }
 0x12b   :  { %v146_v36 = vmul.f32 %v291_v35, %v142_v34  ;;  %v144_v37 = vpop.xlane.xlu1 %143 }
 0x12c   :  { %292 = vrsqrt.f32 %v144_v37  ;;  %vm164_vm2 = vcmp.eq.f32.partialorder %v144_v37, inf  ;;  %v167_v54 = vand.u32 2147483648, %v144_v37  ;;  %vm166_vm3 = vcmp.eq.f32.partialorder %v144_v37, 0.0 }
 0x12d   :  { %v147_v38 = vmul.f32 %v291_v35, %v146_v36 }
 0x12f   :  { %v148_v39 = vmul.f32 0.5, %v147_v38 }
 0x131   :  { %v149_v40 = vsub.f32 1.5, %v148_v39 }
 0x132   :  { %v293_v41 = vpop.eup %292 }
 0x133   :  { %v150_v42 = vmul.f32 %v291_v35, %v149_v40  ;;  %v158_v43 = vmul.f32 %v293_v41, %v144_v37 }
 0x135   :  { %v151_v44 = vmul.f32 %v150_v42, %v142_v34  ;;  %v159_v2 = vmul.f32 %v293_v41, %v158_v43 }
 0x137   :  { %v153_v46 = vsel %vm152_vm0, %v142_v34, %v151_v44  ;;  %v160_v47 = vmul.f32 0.5, %v159_v2 }
 0x138   :  { %v156_v48 = vsel %vm154_vm1, %v155_v45, %v153_v46 }
 0x139   :  { %v161_v49 = vsub.f32 1.5, %v160_v47  ;;  %v169_v50 = vmax.f32 %v156_v48, 1e-15 }
 0x13b   :  { %v162_v51 = vmul.f32 %v293_v41, %v161_v49  ;;  %v171_v52 = vmul.f32 0.83666, %v169_v50 }
 0x13d   :  { %v163_v53 = vmul.f32 %v162_v51, %v144_v37  ;;  %294 = vrcp.f32 %v171_v52  ;;  %v186_v62 = vand.u32 2147483648, %v171_v52  ;;  %v184_v1 = vand.u32 2147483647, %v171_v52 }
 0x13e   :  { %vm180_vm5 = vweird.f32 %v171_v52 }
 0x13f   :  { %v165_v55 = vsel %vm164_vm2, %v144_v37, %v163_v53  ;;  %v187_v5 = vor.u32 1.1754944e-38, %v186_v62  ;;  %vm185_vm7 = vcmp.eq.f32.partialorder %v184_v1, 8.507059e+37 }
 0x140   :  { %v168_v56 = vsel %vm166_vm3, %v167_v54, %v165_v55 }
 0x141   :  { %v170_v57 = vmax.f32 %v168_v56, 1e-15 }
 0x143   :  { %v172_v58 = vmul.f32 0.83666, %v170_v57  ;;  %v295_v59 = vpop.eup %294 }
 0x144   :  { %v176_v60 = vmul.f32 %v295_v59, %v171_v52  ;;  %vm181_vm4 = vweird.f32 %v295_v59 }
 0x145   :  { %296 = vrcp.f32 %v172_v58  ;;  %vm182_vm6 = vmor %vm180_vm5, %vm181_vm4  ;;  %v201_v12 = vand.u32 2147483648, %v172_v58  ;;  %v199_v14 = vand.u32 2147483647, %v172_v58  ;;  %vm195_vm9 = vweird.f32 %v172_v58 }
 0x146   :  { %v177_v61 = vsub.f32 1.0, %v176_v60  ;;  %298 = vtanh.f32 %v171_v52 }
 0x147   :  { %300 = vtanh.f32 %v172_v58  ;;  %v202_v17 = vor.u32 1.1754944e-38, %v201_v12  ;;  %vm200_vm11 = vcmp.eq.f32.partialorder %v199_v14, 8.507059e+37 }
 0x148   :  { %v178_v63 = vmul.f32 %v295_v59, %v177_v61 }
 0x14a   :  { %v179_v4 = vadd.f32 %v295_v59, %v178_v63 }
 0x14b   :  { %v297_v3 = vpop.eup %296 }
 0x14c   :  { %v191_v6 = vmul.f32 %v297_v3, %v172_v58  ;;  %v183_v7 = vsel %vm182_vm6, %v295_v59, %v179_v4  ;;  %v299_v8 = vpop.eup %298  ;;  %vm196_vm8 = vweird.f32 %v297_v3 }
 0x14d   :  { %v188_v9 = vsel %vm185_vm7, %v187_v5, %v183_v7  ;;  %vm197_vm10 = vmor %vm195_vm9, %vm196_vm8  ;;  %v301_v20 = vpop.eup %300 }
 0x14e   :  { %v192_v10 = vsub.f32 1.0, %v191_v6  ;;  %v189_v11 = vmul.f32 %v299_v8, %v188_v9 }
 0x150   :  { %v193_v13 = vmul.f32 %v297_v3, %v192_v10  ;;  %v207_v15 = vmul.f32 %v189_v11, %v156_v48  ;;  %v205_v39 = vmul.f32 %v189_v11, %v411_v26 }
 0x152   :  { %v194_v16 = vadd.f32 %v297_v3, %v193_v13  ;;  %v209_v18 = vmax.f32 %v207_v15, 1e-15 }
 0x154   :  { %v198_v19 = vsel %vm197_vm10, %v297_v3, %v194_v16  ;;  %302 = vrcp.f32 %v209_v18  ;;  %v224_v29 = vand.u32 2147483648, %v209_v18  ;;  %v222_v31 = vand.u32 2147483647, %v209_v18 }
 0x155   :  { %v203_v21 = vsel %vm200_vm11, %v202_v17, %v198_v19  ;;  %vm218_vm13 = vweird.f32 %v209_v18  ;;  %vm211_vm0 = vcmp.gt.f32.partialorder %v209_v18, 1.1904477 }
 0x156   :  { %v204_v22 = vmul.f32 %v301_v20, %v203_v21  ;;  %v225_v34 = vor.u32 1.1754944e-38, %v224_v29  ;;  %vm223_vm15 = vcmp.eq.f32.partialorder %v222_v31, 8.507059e+37 }
 0x158   :  { %v208_v23 = vmul.f32 %v204_v22, %v168_v56  ;;  %v206_v26 = vmul.f32 %v204_v22, %v416_v33 }
 0x15a   :  { %v210_v24 = vmax.f32 %v208_v23, 1e-15  ;;  %v303_v25 = vpop.eup %302 }
 0x15b   :  { %v214_v27 = vmul.f32 %v303_v25, %v209_v18  ;;  %vm219_vm12 = vweird.f32 %v303_v25 }
 0x15c   :  { %304 = vrcp.f32 %v210_v24  ;;  %vm220_vm14 = vmor %vm218_vm13, %vm219_vm12  ;;  %v239_v41 = vand.u32 2147483648, %v210_v24  ;;  %v237_v43 = vand.u32 2147483647, %v210_v24  ;;  %vm233_vm2 = vweird.f32 %v210_v24 }
 0x15d   :  { %v215_v28 = vsub.f32 1.0, %v214_v27  ;;  %vm212_vm5 = vcmp.gt.f32.partialorder %v210_v24, 1.1904477 }
 0x15e   :  { %v240_v46 = vor.u32 1.1754944e-38, %v239_v41  ;;  %vm238_vm4 = vcmp.eq.f32.partialorder %v237_v43, 8.507059e+37 }
 0x15f   :  { %v216_v30 = vmul.f32 %v303_v25, %v215_v28 }
 0x161   :  { %v217_v0 = vadd.f32 %v303_v25, %v216_v30 }
 0x162   :  { %v305_v32 = vpop.eup %304 }
 0x163   :  { %v229_v35 = vmul.f32 %v305_v32, %v210_v24  ;;  %v221_v36 = vsel %vm220_vm14, %v303_v25, %v217_v0  ;;  %vm234_vm1 = vweird.f32 %v305_v32 }
 0x164   :  { %v226_v37 = vsel %vm223_vm15, %v225_v34, %v221_v36  ;;  %vm235_vm3 = vmor %vm233_vm2, %vm234_vm1 }
 0x165   :  { %v230_v38 = vsub.f32 1.0, %v229_v35  ;;  %v227_v40 = vmul.f32 1.1904477, %v226_v37 }
 0x167   :  { %v231_v42 = vmul.f32 %v305_v32, %v230_v38  ;;  %v243_v44 = vsel %vm211_vm0, %v227_v40, 1.0 }
 0x168   :  { %v245_v45 = vmul.f32 %v243_v44, %v205_v39 }
 0x169   :  { %v232_v2 = vadd.f32 %v305_v32, %v231_v42 }
 0x16a   :  { %247 = vst [vmem:[#allocation5] sm:$0xff] %v245_v45 }
 0x16b   :  { %v236_v47 = vsel %vm235_vm3, %v305_v32, %v232_v2 }
 0x16c   :  { %v241_v48 = vsel %vm238_vm4, %v240_v46, %v236_v47 }
 0x16d   :  { %v242_v49 = vmul.f32 1.1904477, %v241_v48 }
 0x16f   :  { %v244_v50 = vsel %vm212_vm5, %v242_v49, 1.0 }
 0x170   :  { %v246_v51 = vmul.f32 %v244_v50, %v206_v26 }
 0x172   :  { %248 = vst [vmem:[#allocation5 + $0x8] sm:$0xff] %v246_v51 }
 0x173   :  { %261 = dma.vmem_to_hbm [thread:$0]  %s254_s13, 256, %s256_s16, [#allocation4], %s359_s11, %s359_s11, %s360_s12  }
 0x174   :  { %356 = dma.done.wait [#allocation4], 256  }
 0x175   :  { %357 = vsyncadd [#allocation4], 4294967040 }
 0x176   :  { %266 = vsyncpa [#allocation3], 1 }
 0x177   :  { %267 = vsyncpa [#allocation4], 1 }

</bundles_post_ra>
